<compile_context>
chip_gen: v5e
topology: v5e:2x2
jax: 0.10.0
libtpu: 0.0.40
codegen_flags: <defaults>
</compile_context>

<pallas_src>
import functools
import math

import jax
import jax.numpy as jnp
from jax import lax
from jax.experimental import pallas as pl
from jax.experimental.pallas import tpu as pltpu


def _round_up(v, m):
    return ((v + m - 1) // m) * m


# ---------------------------------------------------------------------------
# Kernel
# ---------------------------------------------------------------------------
def _self_attention_kernel(x_ref, wqkv_ref, bqkv_ref, wo_ref, bo_ref,
                           out_ref, *rest, bt, sp, fp, n_keys, exact_recip):
    """One grid step processes `bt` batch elements (rows pre-flattened).

    x_ref:    (bt*sp, fp)   activations, already in the MXU compute dtype
    wqkv_ref: (fp, 3*fp)    fused [q|k|v] weight (in, out); 1/sqrt(F) folded into q
    bqkv_ref: (1, 3*fp)     fused bias (f32); 1/sqrt(F) folded into the q part
    wo_ref:   (fp, fp)      output weight (in, out)
    bo_ref:   (1, fp)       output bias (f32)
    out_ref:  (bt*sp, fp)   attention output (lane-dense, flattened rows)
    rest[0]:  (bt, sp, sp)  optional softmax attention map
    """
    attn_ref = rest[0] if rest else None
    cdt = wqkv_ref.dtype  # MXU operand dtype; accumulation always f32

    # ---- Fused QKV projection: one MXU pass with M = bt*sp, K = fp, N = 3*fp ----
    qkv = jnp.dot(x_ref[...], wqkv_ref[...],
                  preferred_element_type=jnp.float32) + bqkv_ref[...]
    qkv = qkv.reshape(bt, sp, 3 * fp)          # tile-aligned (fp % 128 == 0)
    q = qkv[:, :, 0 * fp:1 * fp]               # 1/sqrt(F) already folded in
    k = qkv[:, :, 1 * fp:2 * fp]
    v = qkv[:, :, 2 * fp:3 * fp]

    # ---- Scores: contract feature dims directly (no explicit k.T / XLU transpose) ----
    scores = jnp.einsum("bqf,bkf->bqk", q.astype(cdt), k.astype(cdt),
                        preferred_element_type=jnp.float32)
    if n_keys < sp:  # static branch: mask zero-padded key rows
        key_ids = lax.broadcasted_iota(jnp.int32, (1, 1, sp), 2)
        scores = jnp.where(key_ids < n_keys, scores, -1e9)

    # ---- Numerically stable softmax ----
    scores = scores - jnp.max(scores, axis=-1, keepdims=True)
    e = jnp.exp(scores)
    denom = jnp.sum(e, axis=-1, keepdims=True)
    if exact_recip:
        attn = e / denom                                   # exact (f32 path)
    else:
        attn = e * pl.reciprocal(denom, approx=True)       # EUP slot, nearly free

    # ---- Attention-weighted values, then output projection (rows re-flattened) ----
    ctx = jnp.einsum("bqk,bkf->bqf", attn.astype(cdt), v.astype(cdt),
                     preferred_element_type=jnp.float32)
    out = jnp.dot(ctx.reshape(bt * sp, fp).astype(cdt), wo_ref[...],
                  preferred_element_type=jnp.float32) + bo_ref[...]

    out_ref[...] = out.astype(out_ref.dtype)
    if attn_ref is not None:
        attn_ref[...] = attn.astype(attn_ref.dtype)


# ---------------------------------------------------------------------------
# Generation-aware heuristics
# ---------------------------------------------------------------------------
def _tpu_generation():
    """Coarse, safe detection: v7x has 2 TensorCores/chip and 64 MiB VMEM/TC;
    v5e/v6e have a single TC and 128 MiB VMEM."""
    kind = jax.devices()[0].device_kind.lower()
    is_v7 = ("v7" in kind) or ("tpu7" in kind) or ("7x" in kind)
    vmem_cap = (64 << 20) if is_v7 else (128 << 20)
    return vmem_cap, (2 if is_v7 else 1)


@functools.lru_cache(maxsize=None)
def _single_buffer_supported():
    """Feature-detect pl.Buffered(1) ONCE on a tiny independent probe kernel, so
    the real kernel never hides genuine lowering/numerical errors behind a retry."""
    if not hasattr(pl, "Buffered"):
        return False

    def probe(a_ref, o_ref):
        o_ref[...] = a_ref[...] + 1.0

    try:
        fn = pl.pallas_call(
            probe,
            out_shape=jax.ShapeDtypeStruct((8, 128), jnp.float32),
            grid=(1,),
            in_specs=[pl.BlockSpec((8, 128), lambda i: (0, 0),
                                   pipeline_mode=pl.Buffered(1))],
            out_specs=pl.BlockSpec((8, 128), lambda i: (0, 0)))
        jax.jit(fn).lower(jnp.zeros((8, 128), jnp.float32)).compile()
        return True
    except Exception:  # probe only — genuine errors in the real kernel still surface
        return False


def _vmem_bytes(bt, sp, fp, cs, out_size, attn_size, weight_buffers):
    """Rough per-step VMEM footprint: pipelined blocks (x2 buffers), weights,
    and the f32 intermediates (qkv, scores/attn, ctx/out)."""
    x_blk = bt * sp * fp * cs * 2
    out_blk = bt * sp * fp * out_size * 2
    attn_blk = bt * sp * sp * attn_size * 2 if attn_size else 0
    weights = (3 * fp * fp + fp * fp) * cs * weight_buffers + 4 * fp * 4 * weight_buffers
    interm = bt * sp * (3 * fp + 2 * fp + 2 * sp) * 4
    return x_blk + out_blk + attn_blk + weights + interm


def _choose_batch_tile(batch, sp, fp, cs, out_size, attn_size, weight_buffers,
                       vmem_budget, multi_core, target_rows=512):
    """Largest divisor bt of `batch` with bt*sp <= target_rows that fits the VMEM
    budget. Only force >= 2 grid steps on chips with 2 TensorCores (v7x); on
    single-TC v5e/v6e the grid is a serial loop so splitting only adds overhead."""
    divisors = [d for d in range(1, batch + 1) if batch % d == 0]
    fitting = [d for d in divisors
               if d * sp <= target_rows
               and _vmem_bytes(d, sp, fp, cs, out_size, attn_size,
                               weight_buffers) <= vmem_budget]
    bt = fitting[-1] if fitting else 1
    if multi_core and batch // bt < 2 and batch > 1:
        smaller = [d for d in divisors if batch // d >= 2]
        if smaller:
            bt = smaller[-1]
    return bt


# ---------------------------------------------------------------------------
# Wrapper
# ---------------------------------------------------------------------------
def self_attention_pallas(x, params, *, compute_dtype=jnp.bfloat16,
                          return_attention=True, attn_dtype=jnp.float32):
    """x: (B, S, F). params: PyTorch-convention Linear weights/biases.

    Returns (output, attention) like SelfAttention.forward with mask=None, or just
    `output` when return_attention=False (skips the (B,S,S) writeback entirely).
    MXU operands use `compute_dtype` (bf16 default, f32 accumulation); pass
    jnp.float32 for full-precision matmuls + exact softmax division.
    Note: with bf16 compute the attention map differs from an f32 softmax by ~1e-3.
    """
    B, S, F = x.shape
    out_dtype = x.dtype
    Fp = _round_up(F, 128)     # lane-dense feature dim
    Sp = _round_up(S, 8)       # sublane-aligned sequence dim
    cs = jnp.dtype(compute_dtype).itemsize
    out_size = jnp.dtype(out_dtype).itemsize
    attn_size = jnp.dtype(attn_dtype).itemsize if return_attention else 0
    exact_recip = jnp.dtype(compute_dtype) == jnp.dtype(jnp.float32)

    # ---- Fuse + pre-transpose + zero-pad weights; fold 1/sqrt(F) into query ----
    scale = 1.0 / math.sqrt(float(F))

    def pad_w(w):  # (F, F) in (in, out) layout -> (Fp, Fp)
        return jnp.zeros((Fp, Fp), jnp.float32).at[:F, :F].set(w)

    def pad_b(b):
        return jnp.zeros((Fp,), jnp.float32).at[:F].set(b)

    wqkv = jnp.concatenate(
        [pad_w(params["query_w"].T * scale),
         pad_w(params["key_w"].T),
         pad_w(params["value_w"].T)], axis=1).astype(compute_dtype)
    bqkv = jnp.concatenate(
        [pad_b(params["query_b"] * scale),
         pad_b(params["key_b"]),
         pad_b(params["value_b"])]).reshape(1, 3 * Fp)
    wo = pad_w(params["output_w"].T).astype(compute_dtype)
    bo = pad_b(params["output_b"]).reshape(1, Fp)

    # ---- Pad + flatten activations; cast to the MXU dtype at the boundary ----
    xp = jnp.zeros((B, Sp, Fp), compute_dtype).at[:, :S, :F].set(
        x.astype(compute_dtype))
    x2d = xp.reshape(B * Sp, Fp)

    # ---- Generation-aware tiling + VMEM budget ----
    vmem_cap, n_tc = _tpu_generation()
    single_buf = _single_buffer_supported()
    weight_buffers = 1 if single_buf else 2
    vmem_budget = vmem_cap - (16 << 20)  # headroom for Mosaic internals
    bt = _choose_batch_tile(B, Sp, Fp, cs, out_size, attn_size, weight_buffers,
                            vmem_budget, multi_core=(n_tc >= 2))
    grid = (B // bt,)

    vmem_est = _vmem_bytes(bt, Sp, Fp, cs, out_size, attn_size, weight_buffers)
    vmem_limit = max(32 << 20,
                     min(int(vmem_est * 1.5) + (4 << 20), vmem_cap - (8 << 20)))

    def const_spec(shape):
        idx = lambda b: (0,) * len(shape)
        if single_buf:
            # Constant-index blocks never need double buffering.
            return pl.BlockSpec(shape, idx, pipeline_mode=pl.Buffered(1))
        return pl.BlockSpec(shape, idx)

    kernel = functools.partial(_self_attention_kernel, bt=bt, sp=Sp, fp=Fp,
                               n_keys=S, exact_recip=exact_recip)

    if return_attention:
        out_shape = (jax.ShapeDtypeStruct((B * Sp, Fp), out_dtype),
                     jax.ShapeDtypeStruct((B, Sp, Sp), attn_dtype))
        out_specs = (pl.BlockSpec((bt * Sp, Fp), lambda b: (b, 0)),
                     pl.BlockSpec((bt, Sp, Sp), lambda b: (b, 0, 0)))
    else:
        out_shape = jax.ShapeDtypeStruct((B * Sp, Fp), out_dtype)
        out_specs = pl.BlockSpec((bt * Sp, Fp), lambda b: (b, 0))

    # Advisory cost model so XLA schedules around the custom call.
    flops = int(B * (8 * Sp * Fp * Fp + 4 * Sp * Sp * Fp))
    transcendentals = int(B * Sp * Sp)
    bytes_accessed = int(B * Sp * Fp * cs                      # x
                         + 4 * Fp * Fp * cs + 4 * Fp * 4       # weights + biases
                         + B * Sp * Fp * out_size              # output
                         + B * Sp * Sp * attn_size)            # optional attn map

    call = pl.pallas_call(
        kernel,
        out_shape=out_shape,
        grid_spec=pltpu.PrefetchScalarGridSpec(
            num_scalar_prefetch=0,
            grid=grid,
            in_specs=[
                pl.BlockSpec((bt * Sp, Fp), lambda b: (b, 0)),  # x (flattened rows)
                const_spec((Fp, 3 * Fp)),                       # fused W_qkv
                const_spec((1, 3 * Fp)),                        # fused b_qkv
                const_spec((Fp, Fp)),                           # W_out
                const_spec((1, Fp)),                            # b_out
            ],
            out_specs=out_specs,
        ),
        compiler_params=pltpu.CompilerParams(
            dimension_semantics=("parallel",),
            vmem_limit_bytes=int(vmem_limit)),
        cost_estimate=pl.CostEstimate(flops=flops,
                                      transcendentals=transcendentals,
                                      bytes_accessed=bytes_accessed),
    )

    if return_attention:
        out2d, attn = call(x2d, wqkv, bqkv, wo, bo)
        out = out2d.reshape(B, Sp, Fp)[:, :S, :F]
        return out, attn[:, :S, :S]
    out2d = call(x2d, wqkv, bqkv, wo, bo)
    return out2d.reshape(B, Sp, Fp)[:, :S, :F]


# ---------------------------------------------------------------------------
# Reference + params
# ---------------------------------------------------------------------------
def _reference(x, params):
    F_ = x.shape[-1]

    def lin(a, w, b):  # PyTorch nn.Linear: a @ W.T + b
        return jnp.einsum("bsf,of->bso", a, w) + b

    k = lin(x, params["key_w"], params["key_b"])
    q = lin(x, params["query_w"], params["query_b"])
    v = lin(x, params["value_w"], params["value_b"])
    scores = jnp.einsum("bqf,bkf->bqk", q, k) / jnp.sqrt(jnp.float32(F_))
    attn = jax.nn.softmax(scores, axis=-1)
    out = jnp.einsum("bqk,bkf->bqf", attn, v)
    out = lin(out, params["output_w"], params["output_b"])
    return out, attn


def init_params(key, feature_size):
    """Deterministic synthetic init; shapes match nn.Linear(feature_size, feature_size)."""
    ks = jax.random.split(key, 8)
    bound = 1.0 / math.sqrt(feature_size)

    def u(k, shape):
        return jax.random.uniform(k, shape, jnp.float32, -bound, bound)

    return {
        "key_w":    u(ks[0], (feature_size, feature_size)),
        "key_b":    u(ks[1], (feature_size,)),
        "query_w":  u(ks[2], (feature_size, feature_size)),
        "query_b":  u(ks[3], (feature_size,)),
        "value_w":  u(ks[4], (feature_size, feature_size)),
        "value_b":  u(ks[5], (feature_size,)),
        "output_w": u(ks[6], (feature_size, feature_size)),
        "output_b": u(ks[7], (feature_size,)),
    }


if __name__ == "__main__":
    B, S, F = 2, 8, 32
    root = jax.random.PRNGKey(0)
    kx, kp = jax.random.split(root)
    x = jax.random.normal(kx, (B, S, F), dtype=jnp.float32)
    params = init_params(kp, F)

    out_expected, attn_expected = _reference(x, params)

    # Full-precision path: exact softmax division, f32 matmuls.
    out32, attn32 = self_attention_pallas(x, params, compute_dtype=jnp.float32)
    jax.block_until_ready((out32, attn32))
    assert jnp.allclose(out32, out_expected, atol=1e-2, rtol=1e-2)
    assert jnp.allclose(attn32, attn_expected, atol=1e-2, rtol=1e-2)

    # Default fast path: bf16 MXU operands, f32 accumulation, approx reciprocal.
    out, attn = self_attention_pallas(x, params)
    jax.block_until_ready((out, attn))
    assert jnp.allclose(out, out_expected, atol=5e-2, rtol=5e-2)
    assert jnp.allclose(attn, attn_expected, atol=3e-2, rtol=3e-2)

    # Output-only path (skips the (B,S,S) attention-map writeback entirely).
    out_only = self_attention_pallas(x, params, return_attention=False)
    jax.block_until_ready(out_only)
    assert jnp.allclose(out_only, out, atol=1e-5, rtol=1e-5)

    print("KERNEL_OK")
</pallas_src>

<mosaic_0001>
module attributes {stable_mosaic.version = 11 : i64} {
  func.func @_self_attention_kernel(%arg0: i32, %arg1: memref<16x128xf32, #tpu.memory_space<vmem>>, %arg2: memref<128x384xf32, #tpu.memory_space<vmem>>, %arg3: memref<1x384xf32, #tpu.memory_space<vmem>>, %arg4: memref<128x128xf32, #tpu.memory_space<vmem>>, %arg5: memref<1x128xf32, #tpu.memory_space<vmem>>, %arg6: memref<16x128xf32, #tpu.memory_space<vmem>>, %arg7: memref<2x8x8xf32, #tpu.memory_space<vmem>>) attributes {dimension_semantics = [#tpu.dimension_semantics<parallel>], iteration_bounds = array<i64: 1>, scalar_prefetch = 0 : i64, scratch_operands = 0 : i64, tpu.core_type = #tpu.core_type<tc>, window_params = [{transform_indices = @transform_0, window_bounds = array<i64: 16, 128>}, {pipeline_mode = #tpu.pipeline_mode<synchronous>, transform_indices = @transform_1, window_bounds = array<i64: 128, 384>}, {pipeline_mode = #tpu.pipeline_mode<synchronous>, transform_indices = @transform_2, window_bounds = array<i64: 1, 384>}, {pipeline_mode = #tpu.pipeline_mode<synchronous>, transform_indices = @transform_3, window_bounds = array<i64: 128, 128>}, {pipeline_mode = #tpu.pipeline_mode<synchronous>, transform_indices = @transform_4, window_bounds = array<i64: 1, 128>}, {transform_indices = @transform_5, window_bounds = array<i64: 16, 128>}, {transform_indices = @transform_6, window_bounds = array<i64: 2, 8, 8>}]} {
    %c0 = arith.constant 0 : index
    %c0_0 = arith.constant 0 : index
    %0 = vector.load %arg1[%c0, %c0_0] : memref<16x128xf32, #tpu.memory_space<vmem>>, vector<16x128xf32>
    %c0_1 = arith.constant 0 : index
    %c0_2 = arith.constant 0 : index
    %1 = vector.load %arg2[%c0_1, %c0_2] : memref<128x384xf32, #tpu.memory_space<vmem>>, vector<128x384xf32>
    %cst = arith.constant dense<0.000000e+00> : vector<16x384xf32>
    %2 = tpu.matmul %0, %1, %cst {dimension_numbers = #tpu.dot_dimension_numbers<[1], [0], [0], [1], [0, 0, 1, 1], [], []>} : vector<16x128xf32>, vector<128x384xf32>, vector<16x384xf32> -> vector<16x384xf32>
    %c0_3 = arith.constant 0 : index
    %c0_4 = arith.constant 0 : index
    %3 = vector.load %arg3[%c0_3, %c0_4] : memref<1x384xf32, #tpu.memory_space<vmem>>, vector<1x384xf32>
    %4 = vector.broadcast %3 : vector<1x384xf32> to vector<16x384xf32>
    %5 = arith.addf %2, %4 : vector<16x384xf32>
    %6 = vector.shape_cast %5 : vector<16x384xf32> to vector<2x8x384xf32>
    %7 = vector.extract_strided_slice %6 {offsets = [0, 0, 0], sizes = [2, 8, 128], strides = [1, 1, 1]} : vector<2x8x384xf32> to vector<2x8x128xf32>
    %8 = vector.extract_strided_slice %6 {offsets = [0, 0, 128], sizes = [2, 8, 128], strides = [1, 1, 1]} : vector<2x8x384xf32> to vector<2x8x128xf32>
    %9 = vector.extract_strided_slice %6 {offsets = [0, 0, 256], sizes = [2, 8, 128], strides = [1, 1, 1]} : vector<2x8x384xf32> to vector<2x8x128xf32>
    "tpu.trace_start"() <{level = 10 : i32, message = "bqf,bkf->bqk"}> : () -> ()
    %cst_5 = arith.constant dense<0.000000e+00> : vector<2x8x8xf32>
    %10 = tpu.matmul %7, %8, %cst_5 {dimension_numbers = #tpu.dot_dimension_numbers<[2], [2], [1], [1], [0, 0, 0, 1, 1, 1], [0], [0]>} : vector<2x8x128xf32>, vector<2x8x128xf32>, vector<2x8x8xf32> -> vector<2x8x8xf32>
    "tpu.trace_stop"() : () -> ()
    %cst_6 = arith.constant dense<0xFF800000> : vector<2x8xf32>
    %11 = vector.multi_reduction <maximumf>, %10, %cst_6 [2] : vector<2x8x8xf32> to vector<2x8xf32>
    %12 = vector.shape_cast %11 : vector<2x8xf32> to vector<2x8x1xf32>
    %13 = vector.broadcast %12 : vector<2x8x1xf32> to vector<2x8x8xf32>
    %14 = arith.subf %10, %13 : vector<2x8x8xf32>
    %15 = math.exp %14 : vector<2x8x8xf32>
    %cst_7 = arith.constant dense<0.000000e+00> : vector<2x8xf32>
    %16 = vector.multi_reduction <add>, %15, %cst_7 [2] : vector<2x8x8xf32> to vector<2x8xf32>
    %17 = vector.shape_cast %16 : vector<2x8xf32> to vector<2x8x1xf32>
    %18 = vector.broadcast %17 : vector<2x8x1xf32> to vector<2x8x8xf32>
    %19 = arith.divf %15, %18 : vector<2x8x8xf32>
    "tpu.trace_start"() <{level = 10 : i32, message = "bqk,bkf->bqf"}> : () -> ()
    %cst_8 = arith.constant dense<0.000000e+00> : vector<2x8x128xf32>
    %20 = tpu.matmul %19, %9, %cst_8 {dimension_numbers = #tpu.dot_dimension_numbers<[2], [1], [1], [2], [0, 0, 0, 1, 1, 2], [0], [0]>} : vector<2x8x8xf32>, vector<2x8x128xf32>, vector<2x8x128xf32> -> vector<2x8x128xf32>
    "tpu.trace_stop"() : () -> ()
    %21 = vector.shape_cast %20 : vector<2x8x128xf32> to vector<16x128xf32>
    %c0_9 = arith.constant 0 : index
    %c0_10 = arith.constant 0 : index
    %22 = vector.load %arg4[%c0_9, %c0_10] : memref<128x128xf32, #tpu.memory_space<vmem>>, vector<128x128xf32>
    %cst_11 = arith.constant dense<0.000000e+00> : vector<16x128xf32>
    %23 = tpu.matmul %21, %22, %cst_11 {dimension_numbers = #tpu.dot_dimension_numbers<[1], [0], [0], [1], [0, 0, 1, 1], [], []>} : vector<16x128xf32>, vector<128x128xf32>, vector<16x128xf32> -> vector<16x128xf32>
    %c0_12 = arith.constant 0 : index
    %c0_13 = arith.constant 0 : index
    %24 = vector.load %arg5[%c0_12, %c0_13] : memref<1x128xf32, #tpu.memory_space<vmem>>, vector<1x128xf32>
    %25 = vector.broadcast %24 : vector<1x128xf32> to vector<16x128xf32>
    %26 = arith.addf %23, %25 : vector<16x128xf32>
    %c0_14 = arith.constant 0 : index
    %c0_15 = arith.constant 0 : index
    %27 = vector.load %arg6[%c0_14, %c0_15] : memref<16x128xf32, #tpu.memory_space<vmem>>, vector<16x128xf32>
    tpu.vector_store %arg6[%c0_14, %c0_15], %26 {strides = array<i32>} : memref<16x128xf32, #tpu.memory_space<vmem>>, vector<16x128xf32>,
    %c0_16 = arith.constant 0 : index
    %c0_17 = arith.constant 0 : index
    %c0_18 = arith.constant 0 : index
    %28 = vector.load %arg7[%c0_16, %c0_17, %c0_18] : memref<2x8x8xf32, #tpu.memory_space<vmem>>, vector<2x8x8xf32>
    tpu.vector_store %arg7[%c0_16, %c0_17, %c0_18], %19 {strides = array<i32>} : memref<2x8x8xf32, #tpu.memory_space<vmem>>, vector<2x8x8xf32>,
    return
  }
  func.func @transform_0(%arg0: i32) -> (i32, i32) {
    %c0_i32 = arith.constant 0 : i32
    %c0_i32_0 = arith.constant 0 : i32
    return %arg0, %c0_i32 : i32, i32
  }
  func.func @transform_1(%arg0: i32) -> (i32, i32) {
    %c0_i32 = arith.constant 0 : i32
    %c0_i32_0 = arith.constant 0 : i32
    %c0_i32_1 = arith.constant 0 : i32
    return %c0_i32, %c0_i32_0 : i32, i32
  }
  func.func @transform_2(%arg0: i32) -> (i32, i32) {
    %c0_i32 = arith.constant 0 : i32
    %c0_i32_0 = arith.constant 0 : i32
    %c0_i32_1 = arith.constant 0 : i32
    return %c0_i32, %c0_i32_0 : i32, i32
  }
  func.func @transform_3(%arg0: i32) -> (i32, i32) {
    %c0_i32 = arith.constant 0 : i32
    %c0_i32_0 = arith.constant 0 : i32
    %c0_i32_1 = arith.constant 0 : i32
    return %c0_i32, %c0_i32_0 : i32, i32
  }
  func.func @transform_4(%arg0: i32) -> (i32, i32) {
    %c0_i32 = arith.constant 0 : i32
    %c0_i32_0 = arith.constant 0 : i32
    %c0_i32_1 = arith.constant 0 : i32
    return %c0_i32, %c0_i32_0 : i32, i32
  }
  func.func @transform_5(%arg0: i32) -> (i32, i32) {
    %c0_i32 = arith.constant 0 : i32
    %c0_i32_0 = arith.constant 0 : i32
    return %arg0, %c0_i32 : i32, i32
  }
  func.func @transform_6(%arg0: i32) -> (i32, i32, i32) {
    %c0_i32 = arith.constant 0 : i32
    %c0_i32_0 = arith.constant 0 : i32
    %c0_i32_1 = arith.constant 0 : i32
    return %arg0, %c0_i32, %c0_i32_0 : i32, i32, i32
  }
}

</mosaic_0001>

<bundles_post_ra>
// kernel: tpu_custom_call.1
= control target key start
LH: loop header
LB: loop body
LE: loop exit
PB: predicated region body
PF: predicated region fallthrough
CT: control target
= control target key end

     0   :  { %12 = vsyncpa [#allocation3], 0  ;;  %s703_s0 = inlined_call_operand.hbm [shape: f32[16,128], index: 0, kind: input, shape index: {}]   ;;  %s704_s1 = inlined_call_operand.hbm [shape: f32[128,384], index: 1, kind: input, shape index: {}]   ;;  %s705_s2 = inlined_call_operand.hbm [shape: f32[1,384], index: 2, kind: input, shape index: {}]   ;;  %s706_s3 = inlined_call_operand.hbm [shape: f32[128,128], index: 3, kind: input, shape index: {}]   ;;  %s707_s4 = inlined_call_operand.vmem [shape: f32[1,128], index: 4, kind: input, shape index: {}]   ;;  %s708_s5 = inlined_call_operand.hbm [shape: f32[16,128], index: 5, kind: output, shape index: {0}]   ;;  %s709_s6 = inlined_call_operand.hbm [shape: f32[2,8,8], index: 6, kind: output, shape index: {1}]  }
   0x1   :  { %13 = vsyncpa [#allocation6], 0 }
   0x2   :  { %14 = vsyncpa [#allocation9], 0 }
   0x3   :  { %15 = vsyncpa [#allocation4], 0  ;;  %s34_s23 = sshll.u32 %s704_s1, 4  ;;  %s35_s23 = int_to_ptr.hbm [resolvable:$true] %s34_s23 }
   0x4   :  { %16 = vsyncpa [#allocation12], 0  ;;  %s608_s24 = smov [#allocation5]   ;;  %s21_s28 = sshll.u32 %s703_s0, 4  ;;  %s22_s28 = int_to_ptr.hbm [resolvable:$true] %s21_s28 }
   0x5   :  { %s36_s25 = sshll.u32 %s608_s24, 4  ;;  %s609_s29 = smov 384   ;;  %s37_s25 = int_to_ptr.vmem [resolvable:$true] %s36_s25 }
   0x6   :  { %s610_s30 = smov 24   ;;  %s611_s7 = smov [#allocation2]  }
   0x7   :  { %42 = dma.hbm_to_vmem [thread:$0]  %s35_s23, 6144, %s37_s25, [#allocation6], %s609_s29, %s609_s29, %s610_s30  }
   0x8   :  { %s23_s8 = sshll.u32 %s611_s7, 4  ;;  %s612_s9 = smov 128   ;;  %s24_s8 = int_to_ptr.vmem [resolvable:$true] %s23_s8 }
   0x9   :  { %s613_s10 = smov 8   ;;  %s48_s12 = sshll.u32 %s705_s2, 4  ;;  %s49_s12 = int_to_ptr.hbm [resolvable:$true] %s48_s12 }
   0xa   :  { %29 = dma.hbm_to_vmem [thread:$0]  %s22_s28, 256, %s24_s8, [#allocation3], %s612_s9, %s612_s9, %s613_s10  }
   0xb   :  { %s614_s13 = smov [#allocation7]   ;;  %s58_s16 = sshll.u32 %s706_s3, 4  ;;  %s59_s16 = int_to_ptr.hbm [resolvable:$true] %s58_s16 }
   0xc   :  { %s50_s0 = sshll.u32 %s614_s13, 4  ;;  %s615_s17 = smov [#allocation8]   ;;  %s51_s0 = int_to_ptr.vmem [resolvable:$true] %s50_s0 }
   0xd   :  { %53 = dma.hbm_to_vmem [thread:$0]  %s49_s12, 48, %s51_s0, [#allocation6]  }
   0xe   :  { %s60_s18 = sshll.u32 %s615_s17, 4  ;;  %s61_s18 = int_to_ptr.vmem [resolvable:$true] %s60_s18 }
   0xf   :  { %66 = dma.hbm_to_vmem [thread:$0]  %s59_s16, 2048, %s61_s18, [#allocation9], %s612_s9, %s612_s9, %s613_s10  }
  0x10   :  { %598 = dma.done.wait [#allocation3], 256  }
  0x11   :  { %599 = vsyncadd [#allocation3], 4294967040 }
  0x12   :  { %600 = dma.done.wait [#allocation6], 6192  }
  0x13   :  { %601 = vsyncadd [#allocation6], 4294961104 }
  0x14   :  { %602 = dma.done.wait [#allocation9], 2048  }
  0x15   :  { %603 = vsyncadd [#allocation9], 4294965248  ;;  %v133_v0 = vld [vmem:[#allocation5 + $0x170] sm:$0xff]  ;;  %v130_v1 = vld [vmem:[#allocation5 + $0x158] sm:$0xff]  ;;  %vm252_vm0 = vcmask 64512   ;;  %s616_s2 = smov [#allocation11]  }
  0x16   :  { %v132_v2 = vld [vmem:[#allocation5 + $0x168] sm:$0xff]  ;;  %166 = vmatpush.msra.mxu1 %v133_v0  ;;  %v129_v3 = vld [vmem:[#allocation5 + $0x150] sm:$0xff]  ;;  %v127_v4 = vld [vmem:[#allocation5 + $0x140] sm:$0xff]  ;;  %s411_s3 = sshll.u32 %s616_s2, 4  ;;  %s413_s21 = sshll.u32 %s709_s6, 4  ;;  %s412_s3 = int_to_ptr.vmem [resolvable:$true] %s411_s3  ;;  %s414_s21 = int_to_ptr.hbm [resolvable:$true] %s413_s21 }
  0x17   :  { %143 = vmatpush.msra.mxu0 %v132_v2  ;;  %v126_v5 = vld [vmem:[#allocation5 + $0x138] sm:$0xff]  ;;  %v124_v6 = vld [vmem:[#allocation5 + $0x128] sm:$0xff]  ;;  %v123_v7 = vld [vmem:[#allocation5 + $0x120] sm:$0xff]  ;;  %s617_s24 = smov [#allocation10]   ;;  %s400_s28 = sshll.u32 %s708_s5, 4  ;;  %s401_s28 = int_to_ptr.hbm [resolvable:$true] %s400_s28 }
  0x18   :  { %167 = vmatpush.msra.mxu1 %v130_v1  ;;  %v121_v8 = vld [vmem:[#allocation5 + $0x110] sm:$0xff]  ;;  %v120_v9 = vld [vmem:[#allocation5 + $0x108] sm:$0xff]  ;;  %v118_v10 = vld [vmem:[#allocation5 + $0xf8] sm:$0xff]  ;;  %s398_s25 = sshll.u32 %s617_s24, 4  ;;  %s399_s25 = int_to_ptr.vmem [resolvable:$true] %s398_s25 }
  0x19   :  { %144 = vmatpush.msra.mxu0 %v129_v3  ;;  %v117_v11 = vld [vmem:[#allocation5 + $0xf0] sm:$0xff]  ;;  %v115_v12 = vld [vmem:[#allocation5 + $0xe0] sm:$0xff]  ;;  %v114_v13 = vld [vmem:[#allocation5 + $0xd8] sm:$0xff] }
  0x1a   :  { %168 = vmatpush.msra.mxu1 %v127_v4  ;;  %v112_v14 = vld [vmem:[#allocation5 + $0xc8] sm:$0xff]  ;;  %v111_v15 = vld [vmem:[#allocation5 + $0xc0] sm:$0xff]  ;;  %v109_v16 = vld [vmem:[#allocation5 + $0xb0] sm:$0xff] }
  0x1b   :  { %145 = vmatpush.msra.mxu0 %v126_v5  ;;  %v108_v17 = vld [vmem:[#allocation5 + $0xa8] sm:$0xff]  ;;  %v106_v18 = vld [vmem:[#allocation5 + $0x98] sm:$0xff]  ;;  %v105_v19 = vld [vmem:[#allocation5 + $0x90] sm:$0xff] }
  0x1c   :  { %169 = vmatpush.msra.mxu1 %v124_v6  ;;  %v103_v20 = vld [vmem:[#allocation5 + $0x80] sm:$0xff]  ;;  %v102_v21 = vld [vmem:[#allocation5 + $0x78] sm:$0xff]  ;;  %v100_v22 = vld [vmem:[#allocation5 + $0x68] sm:$0xff] }
  0x1d   :  { %146 = vmatpush.msra.mxu0 %v123_v7  ;;  %v99_v23 = vld [vmem:[#allocation5 + $0x60] sm:$0xff]  ;;  %v97_v24 = vld [vmem:[#allocation5 + $0x50] sm:$0xff]  ;;  %v96_v25 = vld [vmem:[#allocation5 + $0x48] sm:$0xff] }
  0x1e   :  { %170 = vmatpush.msra.mxu1 %v121_v8  ;;  %v94_v26 = vld [vmem:[#allocation5 + $0x38] sm:$0xff]  ;;  %v93_v27 = vld [vmem:[#allocation5 + $0x30] sm:$0xff]  ;;  %v91_v28 = vld [vmem:[#allocation5 + $0x20] sm:$0xff] }
  0x1f   :  { %147 = vmatpush.msra.mxu0 %v120_v9  ;;  %v90_v29 = vld [vmem:[#allocation5 + $0x18] sm:$0xff]  ;;  %v88_v30 = vld [vmem:[#allocation5 + $0x8] sm:$0xff]  ;;  %v87_v31 = vld [vmem:[#allocation5] sm:$0xff] }
  0x20   :  { %171 = vmatpush.msra.mxu1 %v118_v10  ;;  %v85_v32 = vld [vmem:[#allocation2] sm:$0xff]  ;;  %v86_v33 = vld [vmem:[#allocation2 + $0x8] sm:$0xff]  ;;  %v671_v34 = vld [vmem:[#allocation7] sm:$0x7] }
  0x21   :  { %148 = vmatpush.msra.mxu0 %v117_v11  ;;  %v138_v35 = vperm.slane %v671_v34, 1  ;;  %v137_v36 = vperm.slane %v671_v34, 0  ;;  %v134_v45 = vld [vmem:[#allocation5 + $0x178] sm:$0xff]  ;;  %v131_v46 = vld [vmem:[#allocation5 + $0x160] sm:$0xff]  ;;  %v128_v47 = vld [vmem:[#allocation5 + $0x148] sm:$0xff]  ;;  %v139_v11 = vperm.slane %v671_v34, 2 }
  0x22   :  { %172 = vmatpush.msra.mxu1 %v115_v12  ;;  %189 = vmatpush.msra.mxu2 %v134_v45  ;;  %v125_v48 = vld [vmem:[#allocation5 + $0x130] sm:$0xff]  ;;  %v122_v49 = vld [vmem:[#allocation5 + $0x118] sm:$0xff]  ;;  %v119_v50 = vld [vmem:[#allocation5 + $0x100] sm:$0xff] }
  0x23   :  { %149 = vmatpush.msra.mxu0 %v114_v13  ;;  %v116_v51 = vld [vmem:[#allocation5 + $0xe8] sm:$0xff]  ;;  %v113_v52 = vld [vmem:[#allocation5 + $0xd0] sm:$0xff]  ;;  %v110_v53 = vld [vmem:[#allocation5 + $0xb8] sm:$0xff] }
  0x24   :  { %173 = vmatpush.msra.mxu1 %v112_v14  ;;  %190 = vmatpush.msra.mxu2 %v131_v46  ;;  %v107_v54 = vld [vmem:[#allocation5 + $0xa0] sm:$0xff]  ;;  %v104_v55 = vld [vmem:[#allocation5 + $0x88] sm:$0xff]  ;;  %v101_v60 = vld [vmem:[#allocation5 + $0x70] sm:$0xff] }
  0x25   :  { %150 = vmatpush.msra.mxu0 %v111_v15  ;;  %v98_v61 = vld [vmem:[#allocation5 + $0x58] sm:$0xff]  ;;  %v95_v62 = vld [vmem:[#allocation5 + $0x40] sm:$0xff]  ;;  %v92_v63 = vld [vmem:[#allocation5 + $0x28] sm:$0xff] }
  0x26   :  { %174 = vmatpush.msra.mxu1 %v109_v16  ;;  %191 = vmatpush.msra.mxu2 %v128_v47  ;;  %v89_v0 = vld [vmem:[#allocation5 + $0x10] sm:$0xff]  ;;  %v362_v16 = vld [vmem:[#allocation8 + $0x78] sm:$0xff] }
  0x27   :  { %151 = vmatpush.msra.mxu0 %v108_v17  ;;  %v361_v17 = vld [vmem:[#allocation8 + $0x70] sm:$0xff] }
  0x28   :  { %175 = vmatpush.msra.mxu1 %v106_v18  ;;  %192 = vmatpush.msra.mxu2 %v125_v48  ;;  %v360_v18 = vld [vmem:[#allocation8 + $0x68] sm:$0xff]  ;;  %v349_v48 = vld [vmem:[#allocation8 + $0x10] sm:$0xff] }
  0x29   :  { %152 = vmatpush.msra.mxu0 %v105_v19 }
  0x2a   :  { %176 = vmatpush.msra.mxu1 %v103_v20  ;;  %193 = vmatpush.msra.mxu2 %v122_v49  ;;  %v359_v20 = vld [vmem:[#allocation8 + $0x60] sm:$0xff] }
  0x2b   :  { %153 = vmatpush.msra.mxu0 %v102_v21  ;;  %v358_v21 = vld [vmem:[#allocation8 + $0x58] sm:$0xff] }
  0x2c   :  { %177 = vmatpush.msra.mxu1 %v100_v22  ;;  %194 = vmatpush.msra.mxu2 %v119_v50  ;;  %v357_v22 = vld [vmem:[#allocation8 + $0x50] sm:$0xff]  ;;  %v348_v50 = vld [vmem:[#allocation8 + $0x8] sm:$0xff] }
  0x2d   :  { %154 = vmatpush.msra.mxu0 %v99_v23  ;;  %v356_v23 = vld [vmem:[#allocation8 + $0x48] sm:$0xff] }
  0x2e   :  { %178 = vmatpush.msra.mxu1 %v97_v24  ;;  %195 = vmatpush.msra.mxu2 %v116_v51 }
  0x2f   :  { %155 = vmatpush.msra.mxu0 %v96_v25 }
  0x30   :  { %179 = vmatpush.msra.mxu1 %v94_v26  ;;  %196 = vmatpush.msra.mxu2 %v113_v52 }
  0x31   :  { %156 = vmatpush.msra.mxu0 %v93_v27  ;;  %v355_v27 = vld [vmem:[#allocation8 + $0x40] sm:$0xff] }
  0x32   :  { %180 = vmatpush.msra.mxu1 %v91_v28  ;;  %197 = vmatpush.msra.mxu2 %v110_v53 }
  0x33   :  { %157 = vmatpush.msra.mxu0 %v90_v29  ;;  %v354_v29 = vld [vmem:[#allocation8 + $0x38] sm:$0xff] }
  0x34   :  { %181 = vmatpush.msra.mxu1 %v88_v30  ;;  %198 = vmatpush.msra.mxu2 %v107_v54 }
  0x35   :  { %158 = vmatpush.msra.mxu0 %v87_v31  ;;  %182 = vmatmul.f32.vlgmr.msra.gmra.mxu1 %v85_v32 }
  0x36   :  { %159 = vmatmul.f32.vlgmr.msra.gmra.mxu0 %v85_v32  ;;  %199 = vmatpush.msra.mxu2 %v104_v55  ;;  %v347_v55 = vld [vmem:[#allocation8] sm:$0xff] }
  0x38   :  { %200 = vmatpush.msra.mxu2 %v101_v60 }
  0x3a   :  { %201 = vmatpush.msra.mxu2 %v98_v61 }
  0x3c   :  { %202 = vmatpush.msra.mxu2 %v95_v62 }
  0x3d   :  { %185 = vmatmul.f32.gmra.mxu1 %v86_v33 }
  0x3e   :  { %162 = vmatmul.f32.gmra.mxu0 %v86_v33  ;;  %203 = vmatpush.msra.mxu2 %v92_v63 }
  0x40   :  { %204 = vmatpush.msra.mxu2 %v89_v0 }
  0x41   :  { %205 = vmatmul.f32.vlgmr.msra.gmra.mxu2 %v85_v32 }
  0x49   :  { %208 = vmatmul.f32.gmra.mxu2 %v86_v33  ;;  %v353_v33 = vld [vmem:[#allocation8 + $0x30] sm:$0xff] }
  0xb2   :  { %v183_v37 = vpop.f32.mrf.mxu1 }
  0xb3   :  { %v160_v38 = vpop.f32.mrf.mxu0  ;;  %v184_v39 = vadd.f32 %v183_v37, %v138_v35 }
  0xb4   :  { %v161_v40 = vadd.f32 %v160_v38, %v137_v36 }
  0xb5   :  { %227 = vmatpush.xpose.msrb.mxu0 %v184_v39 }
  0xb8   :  { %228 = vmatmul.f32.vlgmr.msrb.gmra.mxu0 %v161_v40  ;;  %v351_v40 = vld [vmem:[#allocation8 + $0x20] sm:$0xff] }
  0xba   :  { %v186_v41 = vpop.f32.mrf.mxu1 }
  0xbb   :  { %v163_v42 = vpop.f32.mrf.mxu0  ;;  %v187_v43 = vadd.f32 %v186_v41, %v138_v35  ;;  %v352_v35 = vld [vmem:[#allocation8 + $0x28] sm:$0xff] }
  0xbc   :  { %v164_v44 = vadd.f32 %v163_v42, %v137_v36 }
  0xbd   :  { %247 = vmatpush.xpose.msrb.mxu1 %v187_v43 }
  0xc0   :  { %248 = vmatmul.f32.vlgmr.msrb.gmra.mxu1 %v164_v44  ;;  %v350_v44 = vld [vmem:[#allocation8 + $0x18] sm:$0xff] }
  0xc4   :  { %v206_v12 = vpop.f32.mrf.mxu2 }
  0xc5   :  { %v207_v13 = vadd.f32 %v206_v12, %v139_v11 }
  0xc7   :  { %319 = vmatpush.msrb.mxu2 %v207_v13 }
  0xcc   :  { %v209_v14 = vpop.f32.mrf.mxu2 }
  0xcd   :  { %v210_v15 = vadd.f32 %v209_v14, %v139_v11 }
  0xcf   :  { %342 = vmatpush.msra.mxu3 %v210_v15 }
  0xd1   :  { %367 = vmatpush.msrb.mxu3 %v362_v16 }
  0xd3   :  { %368 = vmatpush.msrb.mxu3 %v361_v17 }
  0xd5   :  { %369 = vmatpush.msrb.mxu3 %v360_v18 }
  0xd7   :  { %370 = vmatpush.msrb.mxu3 %v359_v20 }
  0xd9   :  { %371 = vmatpush.msrb.mxu3 %v358_v21 }
  0xdb   :  { %372 = vmatpush.msrb.mxu3 %v357_v22 }
  0xdd   :  { %373 = vmatpush.msrb.mxu3 %v356_v23 }
  0xdf   :  { %374 = vmatpush.msrb.mxu3 %v355_v27 }
  0xe1   :  { %375 = vmatpush.msrb.mxu3 %v354_v29 }
  0xe3   :  { %376 = vmatpush.msrb.mxu3 %v353_v33 }
  0xe5   :  { %377 = vmatpush.msrb.mxu3 %v352_v35 }
  0xe7   :  { %378 = vmatpush.msrb.mxu3 %v351_v40 }
  0xe9   :  { %379 = vmatpush.msrb.mxu3 %v350_v44 }
  0xeb   :  { %380 = vmatpush.msrb.mxu3 %v349_v48 }
  0xed   :  { %381 = vmatpush.msrb.mxu3 %v348_v50 }
  0xef   :  { %382 = vmatpush.msrb.mxu3 %v347_v55 }
 0x135   :  { %v229_v56 = vpop.f32.mrf.mxu0 }
 0x136   :  { %v253_v57 = vsel %vm252_vm0, %v229_v56, -inf }
 0x137   :  { %254 = vmax.xlane.f32.xlu0 %v253_v57 }
 0x13d   :  { %v249_v58 = vpop.f32.mrf.mxu1 }
 0x13e   :  { %v256_v59 = vsel %vm252_vm0, %v249_v58, -inf }
 0x13f   :  { %257 = vmax.xlane.f32.xlu0 %v256_v59 }
 0x1aa   :  { %v255_v1 = vpop.xlane.xlu0 %254 }
 0x1ab   :  { %v259_v2 = vsub.f32 %v229_v56, %v255_v1 }
 0x1ad   :  { %v261_v3 = vmul.f32 1.442695, %v259_v2 }
 0x1af   :  { %446 = vpow2.f32 %v261_v3 }
 0x1b2   :  { %v258_v4 = vpop.xlane.xlu0 %257 }
 0x1b3   :  { %v260_v5 = vsub.f32 %v249_v58, %v258_v4  ;;  %v445_v58 = vld [vmem:[%s707_s4] ss:$0 sm:$0xff] }
 0x1b5   :  { %v447_v6 = vpop.eup %446  ;;  %v263_v7 = vmul.f32 1.442695, %v260_v5 }
 0x1b6   :  { %v265_v8 = vsel %vm252_vm0, %v447_v6, 0.0 }
 0x1b7   :  { %448 = vpow2.f32 %v263_v7  ;;  %266 = vadd.xlane.f32.xlu1 %v265_v8 }
 0x1bd   :  { %v678_v9 = vpop.eup %448 }
 0x1be   :  { %v268_v10 = vsel %vm252_vm0, %v678_v9, 0.0 }
 0x1bf   :  { %269 = vadd.xlane.f32.xlu1 %v268_v10 }
 0x22a   :  { %v267_v19 = vpop.xlane.xlu1 %266 }
 0x22b   :  { %450 = vrcp.f32 %v267_v19  ;;  %v282_v30 = vand.u32 2147483648, %v267_v19  ;;  %v280_v32 = vand.u32 2147483647, %v267_v19  ;;  %vm276_vm2 = vweird.f32 %v267_v19 }
 0x22d   :  { %v283_v37 = vor.u32 1.1754944e-38, %v282_v30  ;;  %vm281_vm4 = vcmp.eq.f32.partialorder %v280_v32, 8.507059e+37 }
 0x231   :  { %v451_v24 = vpop.eup %450 }
 0x232   :  { %v272_v25 = vmul.f32 %v451_v24, %v267_v19  ;;  %v270_v26 = vpop.xlane.xlu1 %269  ;;  %vm277_vm1 = vweird.f32 %v451_v24 }
 0x233   :  { %452 = vrcp.f32 %v270_v26  ;;  %vm278_vm3 = vmor %vm276_vm2, %vm277_vm1  ;;  %v297_v45 = vand.u32 2147483648, %v270_v26  ;;  %v295_v47 = vand.u32 2147483647, %v270_v26  ;;  %vm291_vm6 = vweird.f32 %v270_v26 }
 0x234   :  { %v273_v28 = vsub.f32 1.0, %v272_v25 }
 0x235   :  { %v298_v51 = vor.u32 1.1754944e-38, %v297_v45  ;;  %vm296_vm8 = vcmp.eq.f32.partialorder %v295_v47, 8.507059e+37 }
 0x236   :  { %v274_v31 = vmul.f32 %v451_v24, %v273_v28 }
 0x238   :  { %v275_v34 = vadd.f32 %v451_v24, %v274_v31 }
 0x239   :  { %v453_v36 = vpop.eup %452 }
 0x23a   :  { %v287_v38 = vmul.f32 %v453_v36, %v270_v26  ;;  %v279_v39 = vsel %vm278_vm3, %v451_v24, %v275_v34  ;;  %vm292_vm5 = vweird.f32 %v453_v36 }
 0x23b   :  { %v284_v41 = vsel %vm281_vm4, %v283_v37, %v279_v39  ;;  %vm293_vm7 = vmor %vm291_vm6, %vm292_vm5 }
 0x23c   :  { %v288_v42 = vsub.f32 1.0, %v287_v38  ;;  %v285_v43 = vmul.f32 %v447_v6, %v284_v41 }
 0x23e   :  { %v289_v46 = vmul.f32 %v453_v36, %v288_v42  ;;  %433 = vmatmul.msk.f32.vlgmr.msrb.gmra.mxu2 %vm252_vm0, %v285_v43  ;;  %392 = vst.msk [vmem:[#allocation11] sm:$0xff] %vm252_vm0, %v285_v43 }
 0x240   :  { %v290_v49 = vadd.f32 %v453_v36, %v289_v46 }
 0x242   :  { %v294_v52 = vsel %vm293_vm7, %v453_v36, %v290_v49 }
 0x243   :  { %v299_v53 = vsel %vm296_vm8, %v298_v51, %v294_v52 }
 0x244   :  { %v300_v54 = vmul.f32 %v678_v9, %v299_v53 }
 0x246   :  { %434 = vmatmul.msk.f32.vlgmr.msra.gmra.mxu3 %vm252_vm0, %v300_v54  ;;  %393 = vst.msk [vmem:[#allocation11 + $0x8] sm:$0xff] %vm252_vm0, %v300_v54 }
 0x247   :  { %419 = dma.vmem_to_hbm [thread:$0]  %s412_s3, 256, %s414_s21, [#allocation12], %s612_s9, %s612_s9, %s613_s10  }
 0x2c1   :  { %v321_v56 = vpop.f32.mrf.mxu2 }
 0x2c2   :  { %383 = vmatmul.f32.vlgmr.msrb.gmra.mxu3 %v321_v56 }
 0x2c9   :  { %v344_v57 = vpop.f32.mrf.mxu3 }
 0x2ca   :  { %386 = vmatmul.f32.gmra.mxu3 %v344_v57 }
 0x345   :  { %v384_v59 = vpop.f32.mrf.mxu3 }
 0x346   :  { %v385_v60 = vadd.f32 %v445_v58, %v384_v59 }
 0x348   :  { %390 = vst [vmem:[#allocation10] sm:$0xff] %v385_v60 }
 0x34d   :  { %v387_v61 = vpop.f32.mrf.mxu3 }
 0x34e   :  { %v388_v62 = vadd.f32 %v445_v58, %v387_v61 }
 0x350   :  { %391 = vst [vmem:[#allocation10 + $0x8] sm:$0xff] %v388_v62 }
 0x351   :  { %406 = dma.vmem_to_hbm [thread:$0]  %s399_s25, 256, %s401_s28, [#allocation4], %s612_s9, %s612_s9, %s613_s10  }
 0x352   :  { %604 = dma.done.wait [#allocation4], 256  }
 0x353   :  { %605 = vsyncadd [#allocation4], 4294967040 }
 0x354   :  { %606 = dma.done.wait [#allocation12], 256  }
 0x355   :  { %607 = vsyncadd [#allocation12], 4294967040 }
 0x356   :  { %428 = vsyncpa [#allocation3], 1 }
 0x357   :  { %429 = vsyncpa [#allocation6], 1 }
 0x358   :  { %430 = vsyncpa [#allocation9], 1 }
 0x359   :  { %431 = vsyncpa [#allocation4], 1 }
 0x35a   :  { %432 = vsyncpa [#allocation12], 1 }

</bundles_post_ra>
